<compile_context>
chip_gen: v5e
topology: v5e:2x2
jax: 0.10.0
libtpu: 0.0.40
codegen_flags: <defaults>
</compile_context>

<pallas_src>
import jax
import jax.numpy as jnp
import numpy as np
from jax.experimental import pallas as pl
from jax.experimental.pallas import tpu as pltpu  # noqa: F401  (kept for TPU-specific params if needed)

# Standard SPIN / SMPLify-X constant.
H36M_TO_J17 = [6, 5, 4, 1, 2, 3, 16, 15, 14, 11, 12, 13, 8, 10, 0, 7, 9]


def make_joint_loss_kernel(rho):
    rho2 = float(rho) ** 2

    def kernel(jreg_ref, verts_ref, gt_ref, w2_ref, out_ref):
        # jreg_ref : (17, V)   permuted regressor rows, V lane-dense
        # verts_ref: (3B, V)   batched vertex slab, V lane-dense
        # gt_ref   : (3B, 17)  pre-centered / pre-scaled gt joints (row = b*3 + coord)
        # w2_ref   : (1, 17)   per-joint weight^2 * joint_dist_weight (lane-major)
        jr = jreg_ref[...]
        vt = verts_ref[...]

        # One MXU contraction over V covering every batch & coordinate:
        #   (3B, V) . (17, V)^T -> (3B, 17)  (both operands lane-dense in V)
        pred = jax.lax.dot_general(
            vt, jr,
            dimension_numbers=(((1,), (1,)), ((), ())),
            preferred_element_type=jnp.float32)

        # Center predicted joints on the sacrum (joint 6, already permuted).
        pred_c = pred - pred[:, 6:7]

        # Geman-McClure robustifier on the residual.
        d = gt_ref[...] - pred_c
        d2 = d * d
        dist = rho2 * (d2 / (d2 + rho2))

        # Weighted reduction -> (1, 1) scalar output tile.
        out_ref[...] = jnp.sum(dist * w2_ref[...], keepdims=True)

    return kernel


def smplify_loss(vertices, gt_joints, betas, pose_embedding, J_regressor,
                 joint_conf=None, ign_joint_idx=None,
                 rho=100.0, joint_dist_weight=1.0, body_pose_weight=1.0,
                 shape_prior_weight=1.0, use_joint_conf=True):
    B, V, _ = vertices.shape
    J = gt_joints.shape[1]                 # 17

    # ---- glue (pre-folded constants, all outside the kernel) ----
    # Static joint permutation folded into the regressor rows (numpy index =>
    # static slice at trace time, no runtime gather).
    jreg_perm = J_regressor[np.array(H36M_TO_J17, dtype=np.int32), :]        # (17, V)

    # Lane-dense batched vertex slab: (3B, V), row index = b*3 + coord.
    verts_t = jnp.transpose(vertices, (0, 2, 1)).reshape(3 * B, V)

    # gt centering on sacrum + mm->m scaling, same (3B, 17) row layout.
    gt_c = (gt_joints - gt_joints[:, 6:7, :]) / 1000.0
    gt_c = jnp.transpose(gt_c, (0, 2, 1)).reshape(3 * B, J).astype(jnp.float32)

    # Joint weighting (ignored joints + confidences), pre-squared and
    # pre-scaled by joint_dist_weight, lane-major (1, J).
    joint_weight = np.ones((J,), np.float32)
    if ign_joint_idx is not None:
        joint_weight[np.asarray(ign_joint_idx)] = 0.0
    joint_weight = jnp.asarray(joint_weight)
    if joint_conf is not None and use_joint_conf:
        joint_weight = joint_weight * joint_conf.astype(jnp.float32)
    w2 = (joint_weight * joint_weight * jnp.float32(joint_dist_weight)).reshape(1, J)

    # ---- single-step Pallas kernel: batched joint regression + robust loss ----
    kernel = make_joint_loss_kernel(rho)
    joint_loss = pl.pallas_call(
        kernel,
        out_shape=jax.ShapeDtypeStruct((1, 1), jnp.float32),
    )(jreg_perm.astype(jnp.float32),
      verts_t.astype(jnp.float32),
      gt_c,
      w2)[0, 0]

    # ---- priors: trivial elementwise sums, fused by XLA in the wrapper ----
    # TODO(synk): shape_prior / body_pose_prior are external modules in the
    # PyTorch spec; here they are realized as the standard L2 priors for the
    # use_vposer=True path.
    sprior = jnp.sum(betas.astype(jnp.float32) ** 2) * float(shape_prior_weight) ** 2
    pprior = jnp.sum(pose_embedding.astype(jnp.float32) ** 2) * float(body_pose_weight) ** 2

    return joint_loss + pprior + sprior


def smplify_loss_reference(vertices, gt_joints, betas, pose_embedding,
                           J_regressor, joint_conf, rho, jdw, bpw, spw):
    """Pure-JAX reference mirroring the PyTorch forward (use_vposer=True)."""
    pred = jnp.einsum('jv,bvd->bjd', J_regressor, vertices)
    pred = pred[:, jnp.array(H36M_TO_J17)]
    gt_c = (gt_joints - gt_joints[:, 6:7]) / 1000.0
    pred_c = pred - pred[:, 6:7]
    d2 = (gt_c - pred_c) ** 2
    dist = rho ** 2 * d2 / (d2 + rho ** 2)
    jw = (jnp.ones((gt_joints.shape[1],)) * joint_conf)[:, None]
    joint_loss = jnp.sum(dist * jw[None] ** 2) * jdw
    sprior = jnp.sum(betas ** 2) * spw ** 2
    pprior = jnp.sum(pose_embedding ** 2) * bpw ** 2
    return joint_loss + pprior + sprior


if __name__ == "__main__":
    key = jax.random.PRNGKey(0)
    k1, k2, k3, k4, k5, k6 = jax.random.split(key, 6)

    B, V, J, NB, NE = 2, 432, 17, 10, 32

    # Deterministic synthetic "weights" / inputs (no checkpoint loading).
    J_regressor = jax.nn.softmax(
        jax.random.normal(k1, (J, V), jnp.float32), axis=-1)
    vertices = jax.random.normal(k2, (B, V, 3), jnp.float32)
    gt_joints = jax.random.normal(k3, (B, J, 3), jnp.float32) * 500.0  # mm scale
    betas = jax.random.normal(k4, (B, NB), jnp.float32) * 0.1
    pose_embedding = jax.random.normal(k5, (B, NE), jnp.float32) * 0.1
    joint_conf = jax.nn.sigmoid(jax.random.normal(k6, (J,), jnp.float32))

    rho = 100.0
    joint_dist_weight = 1.0
    body_pose_weight = 2.0
    shape_prior_weight = 3.0

    loss = smplify_loss(
        vertices, gt_joints, betas, pose_embedding, J_regressor,
        joint_conf=joint_conf, rho=rho,
        joint_dist_weight=joint_dist_weight,
        body_pose_weight=body_pose_weight,
        shape_prior_weight=shape_prior_weight,
    )
    loss = jax.block_until_ready(loss)

    ref = smplify_loss_reference(
        vertices, gt_joints, betas, pose_embedding, J_regressor, joint_conf,
        rho, joint_dist_weight, body_pose_weight, shape_prior_weight)
    ref = jax.block_until_ready(ref)

    assert np.allclose(np.asarray(loss), np.asarray(ref), rtol=1e-4, atol=1e-4), \
        (float(loss), float(ref))

    print("KERNEL_OK")
</pallas_src>

<mosaic_0001>
module attributes {stable_mosaic.version = 11 : i64} {
  func.func @kernel(%arg0: memref<17x432xf32, #tpu.memory_space<vmem>>, %arg1: memref<6x432xf32, #tpu.memory_space<vmem>>, %arg2: memref<6x17xf32, #tpu.memory_space<vmem>>, %arg3: memref<1x17xf32, #tpu.memory_space<vmem>>, %arg4: memref<1x1xf32, #tpu.memory_space<vmem>>) attributes {dimension_semantics = [], scalar_prefetch = 0 : i64, scratch_operands = 0 : i64, tpu.core_type = #tpu.core_type<tc>} {
    %c0 = arith.constant 0 : index
    %c0_0 = arith.constant 0 : index
    %0 = vector.load %arg0[%c0, %c0_0] : memref<17x432xf32, #tpu.memory_space<vmem>>, vector<17x432xf32>
    %c0_1 = arith.constant 0 : index
    %c0_2 = arith.constant 0 : index
    %1 = vector.load %arg1[%c0_1, %c0_2] : memref<6x432xf32, #tpu.memory_space<vmem>>, vector<6x432xf32>
    %cst = arith.constant dense<0.000000e+00> : vector<6x17xf32>
    %2 = tpu.matmul %1, %0, %cst {dimension_numbers = #tpu.dot_dimension_numbers<[1], [1], [0], [0], [0, 0, 1, 0], [], []>} : vector<6x432xf32>, vector<17x432xf32>, vector<6x17xf32> -> vector<6x17xf32>
    %3 = vector.extract_strided_slice %2 {offsets = [0, 6], sizes = [6, 1], strides = [1, 1]} : vector<6x17xf32> to vector<6x1xf32>
    %4 = vector.broadcast %3 : vector<6x1xf32> to vector<6x17xf32>
    %5 = arith.subf %2, %4 : vector<6x17xf32>
    %c0_3 = arith.constant 0 : index
    %c0_4 = arith.constant 0 : index
    %6 = vector.load %arg2[%c0_3, %c0_4] : memref<6x17xf32, #tpu.memory_space<vmem>>, vector<6x17xf32>
    %7 = arith.subf %6, %5 : vector<6x17xf32>
    %8 = arith.mulf %7, %7 : vector<6x17xf32>
    %cst_5 = arith.constant 1.000000e+04 : f32
    %9 = vector.broadcast %cst_5 : f32 to vector<6x17xf32>
    %10 = arith.addf %8, %9 : vector<6x17xf32>
    %11 = arith.divf %8, %10 : vector<6x17xf32>
    %cst_6 = arith.constant 1.000000e+04 : f32
    %12 = vector.broadcast %cst_6 : f32 to vector<6x17xf32>
    %13 = arith.mulf %12, %11 : vector<6x17xf32>
    %c0_7 = arith.constant 0 : index
    %c0_8 = arith.constant 0 : index
    %14 = vector.load %arg3[%c0_7, %c0_8] : memref<1x17xf32, #tpu.memory_space<vmem>>, vector<1x17xf32>
    %15 = vector.broadcast %14 : vector<1x17xf32> to vector<6x17xf32>
    %16 = arith.mulf %13, %15 : vector<6x17xf32>
    %17 = vector.shape_cast %16 : vector<6x17xf32> to vector<1x6x17xf32>
    %cst_9 = arith.constant dense<0.000000e+00> : vector<1xf32>
    %18 = vector.multi_reduction <add>, %17, %cst_9 [1, 2] : vector<1x6x17xf32> to vector<1xf32>
    %19 = vector.shape_cast %18 : vector<1xf32> to vector<1x1x1xf32>
    %20 = vector.extract %19[0, 0, 0] : f32 from vector<1x1x1xf32>
    %21 = vector.broadcast %20 : f32 to vector<1x1xf32>
    %c0_10 = arith.constant 0 : index
    %c0_11 = arith.constant 0 : index
    %22 = vector.load %arg4[%c0_10, %c0_11] : memref<1x1xf32, #tpu.memory_space<vmem>>, vector<1x1xf32>
    tpu.vector_store %arg4[%c0_10, %c0_11], %21 {strides = array<i32>} : memref<1x1xf32, #tpu.memory_space<vmem>>, vector<1x1xf32>,
    return
  }
}

</mosaic_0001>

<bundles_post_ra>
// kernel: tpu_custom_call.1
= control target key start
LH: loop header
LB: loop body
LE: loop exit
PB: predicated region body
PF: predicated region fallthrough
CT: control target
= control target key end

     0   :  { %9 = vsyncpa [#allocation3], 0  ;;  %s403_s0 = inlined_call_operand.hbm [shape: f32[17,432], index: 0, kind: input, shape index: {}]   ;;  %s404_s1 = inlined_call_operand.hbm [shape: f32[6,432], index: 1, kind: input, shape index: {}]   ;;  %s405_s2 = inlined_call_operand.hbm [shape: f32[6,17], index: 2, kind: input, shape index: {}]   ;;  %s406_s3 = inlined_call_operand.vmem [shape: f32[1,17], index: 3, kind: input, shape index: {}]   ;;  %s407_s4 = inlined_call_operand.hbm [shape: f32[1,1], index: 4, kind: output, shape index: {}]  }
   0x1   :  { %10 = vsyncpa [#allocation6], 0  ;;  %s30_s17 = sshll.u32 %s404_s1, 4  ;;  %s31_s17 = int_to_ptr.hbm [resolvable:$true] %s30_s17 }
   0x2   :  { %11 = vsyncpa [#allocation4], 0  ;;  %s352_s18 = smov [#allocation5]   ;;  %s16_s22 = sshll.u32 %s403_s0, 4  ;;  %s17_s22 = int_to_ptr.hbm [resolvable:$true] %s16_s22 }
   0x3   :  { %s32_s19 = sshll.u32 %s352_s18, 4  ;;  %s353_s23 = smov [#allocation2]   ;;  %s33_s19 = int_to_ptr.vmem [resolvable:$true] %s32_s19 }
   0x4   :  { %35 = dma.hbm_to_vmem [thread:$0]  %s31_s17, 512, %s33_s19, [#allocation6]  }
   0x5   :  { %s18_s24 = sshll.u32 %s353_s23, 4  ;;  %s354_s25 = smov 512   ;;  %s19_s24 = int_to_ptr.vmem [resolvable:$true] %s18_s24 }
   0x6   :  { %s355_s26 = smov 32   ;;  %s41_s1 = sshll.u32 %s405_s2, 4  ;;  %s42_s1 = int_to_ptr.hbm [resolvable:$true] %s41_s1 }
   0x7   :  { %24 = dma.hbm_to_vmem [thread:$0]  %s17_s22, 1536, %s19_s24, [#allocation3], %s354_s25, %s354_s25, %s355_s26  }
   0x8   :  { %s356_s29 = smov [#allocation7]  }
   0x9   :  { %s43_s30 = sshll.u32 %s356_s29, 4  ;;  %s44_s30 = int_to_ptr.vmem [resolvable:$true] %s43_s30 }
   0xa   :  { %46 = dma.hbm_to_vmem [thread:$0]  %s42_s1, 128, %s44_s30, [#allocation6]  }
   0xb   :  { %346 = dma.done.wait [#allocation3], 1536  }
   0xc   :  { %347 = vsyncadd [#allocation3], 4294965760 }
   0xd   :  { %348 = dma.done.wait [#allocation6], 640  }
   0xe   :  { %349 = vsyncadd [#allocation6], 4294966656  ;;  %vm77_vm0 = vcmask 392192   ;;  %v71_v0 = vld [vmem:[#allocation2 + $0x50] sm:$0x1]  ;;  %v68_v5 = vld [vmem:[#allocation2 + $0x38] sm:$0xff] }
   0xf   :  { %v72_v1 = vld [vmem:[#allocation2 + $0x58] sm:$0x1]  ;;  %v69_v2 = vld [vmem:[#allocation2 + $0x40] sm:$0x1]  ;;  %143 = vmatpush.xpose.msra.mxu2 %v71_v0  ;;  %v70_v3 = vld [vmem:[#allocation2 + $0x48] sm:$0x1] }
  0x10   :  { %233 = vmatpush.xpose.msk.msra.mxu3 %vm77_vm0, %v72_v1  ;;  %103 = vmatpush.xpose.msra.mxu0 %v69_v2  ;;  %v67_v4 = vld [vmem:[#allocation2 + $0x30] sm:$0xff]  ;;  %v65_v6 = vld [vmem:[#allocation2 + $0x20] sm:$0xff]  ;;  %v66_v7 = vld [vmem:[#allocation2 + $0x28] sm:$0xff]  ;;  %v357_v16 = vmov 6   ;;  %vm201_vm5 = vcmask 136192   ;;  %s358_s5 = smov [#allocation8]  }
  0x11   :  { %123 = vmatpush.xpose.msra.mxu1 %v70_v3  ;;  %v63_v8 = vld [vmem:[#allocation2 + $0x10] sm:$0xff]  ;;  %v64_v9 = vld [vmem:[#allocation2 + $0x18] sm:$0xff]  ;;  %v61_v10 = vld [vmem:[#allocation2] sm:$0xff]  ;;  %246 = vset.pattern.permute.xlu0 %v357_v16  ;;  %s220_s6 = sshll.u32 %s358_s5, 4  ;;  %s222_s9 = sshll.u32 %s407_s4, 4  ;;  %vm213_vm6 = vcmask 0   ;;  %s221_s6 = int_to_ptr.vmem [resolvable:$true] %s220_s6  ;;  %s223_s9 = int_to_ptr.hbm [resolvable:$true] %s222_s9 }
  0x12   :  { %v62_v11 = vld [vmem:[#allocation2 + $0x8] sm:$0xff]  ;;  %v75_v12 = vld [vmem:[#allocation5 + $0x10] sm:$0x3f]  ;;  %v76_v13 = vld [vmem:[#allocation5 + $0x18] sm:$0x3f] }
  0x13   :  { %144 = vmatpush.xpose.msra.mxu2 %v67_v4  ;;  %v73_v14 = vld [vmem:[#allocation5] sm:$0x3f]  ;;  %v74_v15 = vld [vmem:[#allocation5 + $0x8] sm:$0x3f] }
  0x14   :  { %234 = vmatpush.xpose.msk.msra.mxu3 %vm77_vm0, %v68_v5  ;;  %104 = vmatpush.xpose.msra.mxu0 %v65_v6  ;;  %v176_v24 = vld [vmem:[#allocation7] sm:$0x3f] }
  0x15   :  { %124 = vmatpush.xpose.msra.mxu1 %v66_v7  ;;  %v247_v41 = vld [vmem:[%s406_s3] ss:$0 sm:$0xff] }
  0x17   :  { %145 = vmatpush.xpose.msra.mxu2 %v63_v8 }
  0x18   :  { %235 = vmatpush.xpose.msk.msra.mxu3 %vm77_vm0, %v64_v9  ;;  %105 = vmatpush.xpose.msra.mxu0 %v61_v10 }
  0x19   :  { %125 = vmatpush.xpose.msra.mxu1 %v62_v11 }
  0x1a   :  { %146 = vmatmul.f32.vlgmr.msra.gmra.mxu2 %v75_v12 }
  0x1b   :  { %236 = vmatmul.msk.f32.vlgmr.msra.gmra.mxu3 %vm77_vm0, %v76_v13  ;;  %106 = vmatmul.f32.vlgmr.msra.gmra.mxu0 %v73_v14 }
  0x1c   :  { %126 = vmatmul.f32.vlgmr.msra.gmra.mxu1 %v74_v15 }
  0x98   :  { %v107_v17 = vpop.f32.mrf.mxu0 }
  0x99   :  { %v127_v18 = vpop.f32.mrf.mxu1 }
  0x9a   :  { %v128_v19 = vadd.f32 %v127_v18, %v107_v17 }
  0x9d   :  { %v147_v20 = vpop.f32.mrf.mxu2 }
  0x9e   :  { %v167_v21 = vpop.f32.mrf.mxu3  ;;  %v148_v22 = vadd.f32 %v147_v20, %v128_v19 }
  0xa0   :  { %v168_v23 = vadd.f32 %v167_v21, %v148_v22 }
  0xa2   :  { %172 = vperm.xlu0 %246, %v168_v23  }
 0x114   :  { %v173_v25 = vpop.permute.xlu0 %172 }
 0x115   :  { %v175_v26 = vsub.f32 %v168_v23, %v173_v25 }
 0x117   :  { %v177_v27 = vsub.f32 %v176_v24, %v175_v26 }
 0x119   :  { %v178_v28 = vmul.f32 %v177_v27, %v177_v27 }
 0x11b   :  { %v179_v29 = vadd.f32 10000.0, %v178_v28 }
 0x11d   :  { %248 = vrcp.f32 %v179_v29  ;;  %v191_v33 = vand.u32 2147483648, %v179_v29  ;;  %v189_v35 = vand.u32 2147483647, %v179_v29  ;;  %vm185_vm2 = vweird.f32 %v179_v29 }
 0x11f   :  { %v192_v37 = vor.u32 1.1754944e-38, %v191_v33  ;;  %vm190_vm4 = vcmp.eq.f32.partialorder %v189_v35, 8.507059e+37 }
 0x123   :  { %v249_v30 = vpop.eup %248 }
 0x124   :  { %v181_v31 = vmul.f32 %v249_v30, %v179_v29  ;;  %vm186_vm1 = vweird.f32 %v249_v30 }
 0x125   :  { %vm187_vm3 = vmor %vm185_vm2, %vm186_vm1 }
 0x126   :  { %v182_v32 = vsub.f32 1.0, %v181_v31 }
 0x128   :  { %v183_v34 = vmul.f32 %v249_v30, %v182_v32 }
 0x12a   :  { %v184_v36 = vadd.f32 %v249_v30, %v183_v34 }
 0x12c   :  { %v188_v38 = vsel %vm187_vm3, %v249_v30, %v184_v36 }
 0x12d   :  { %v193_v39 = vsel %vm190_vm4, %v192_v37, %v188_v38 }
 0x12e   :  { %v194_v40 = vmul.f32 %v193_v39, %v178_v28 }
 0x130   :  { %v195_v42 = vmul.f32 10000.0, %v194_v40 }
 0x132   :  { %v200_v43 = vmul.f32 %v247_v41, %v195_v42 }
 0x134   :  { %v202_v44 = vsel %vm201_vm5, %v200_v43, 0.0 }
 0x135   :  { %203 = vadd.xlane.f32.xlu0 %v202_v44 }
 0x1a8   :  { %v204_v45 = vpop.xlane.xlu0 %203 }
 0x1a9   :  { %v205_v46 = vrot.slane %v204_v45, 4 }
 0x1ab   :  { %v206_v47 = vadd.f32 %v205_v46, %v204_v45 }
 0x1ad   :  { %v207_v48 = vrot.slane %v206_v47, 2 }
 0x1af   :  { %v208_v49 = vadd.f32 %v207_v48, %v206_v47 }
 0x1b1   :  { %v209_v50 = vrot.slane %v208_v49, 1 }
 0x1b3   :  { %v210_v51 = vadd.f32 %v209_v50, %v208_v49 }
 0x1b5   :  { %237 = vpush %v210_v51 }
 0x1e6   :  { %s238_s3 = spop %237 }
 0x1e7   :  { %v212_v52 = vstv %s238_s3 }
 0x1e8   :  { %214 = vst.msk [vmem:[#allocation8] sm:$0x1] %vm213_vm6, %v212_v52 }
 0x1e9   :  { %225 = dma.vmem_to_hbm [thread:$0]  %s221_s6, 16, %s223_s9, [#allocation4]  }
 0x1ea   :  { %350 = dma.done.wait [#allocation4], 16  }
 0x1eb   :  { %351 = vsyncadd [#allocation4], 4294967280 }
 0x1ec   :  { %230 = vsyncpa [#allocation3], 1 }
 0x1ed   :  { %231 = vsyncpa [#allocation6], 1 }
 0x1ee   :  { %232 = vsyncpa [#allocation4], 1 }

</bundles_post_ra>
